<compile_context>
chip_gen: v6e
topology: v6e:2x2x1
jax: 0.10.0
libtpu: 0.0.40
codegen_flags: <defaults>
</compile_context>

<pallas_src>
import jax
import jax.numpy as jnp
import numpy as np
from jax.experimental import pallas as pl
from jax.experimental.pallas import tpu as pltpu


def _round_up(x, m):
    return ((x + m - 1) // m) * m


# --------------------- Stage 1: seq_fts = seq @ W^T --------------------------

def _fts_kernel(seq_ref, w_ref, out_ref):
    out_ref[...] = jnp.dot(seq_ref[...], w_ref[...],
                           preferred_element_type=jnp.float32)


def _compute_seq_fts(seq_pad, w_pad, tm):
    Kp, Fin = seq_pad.shape
    Fout = w_pad.shape[1]
    flops = 2 * Kp * Fin * Fout
    bytes_accessed = 4 * (Kp * Fin + Fin * Fout + Kp * Fout)
    return pl.pallas_call(
        _fts_kernel,
        out_shape=jax.ShapeDtypeStruct((Kp, Fout), jnp.float32),
        grid_spec=pltpu.PrefetchScalarGridSpec(
            num_scalar_prefetch=0,
            grid=(Kp // tm,),
            in_specs=[
                pl.BlockSpec((tm, Fin), lambda i: (i, 0)),       # seq row tile
                pl.BlockSpec((Fin, Fout), lambda i: (0, 0)),     # full W^T
            ],
            out_specs=pl.BlockSpec((tm, Fout), lambda i: (i, 0)),
        ),
        compiler_params=pltpu.CompilerParams(
            dimension_semantics=("parallel",)),
        cost_estimate=pl.CostEstimate(flops=flops, transcendentals=0,
                                      bytes_accessed=bytes_accessed),
    )(seq_pad, w_pad)


# --------------- Stage 2: out = PReLU(adj @ seq_fts + bias) ------------------

def _adj_agg_kernel(alpha_ref, adj_ref, fts_ref, bias_ref, out_ref, acc_ref):
    k = pl.program_id(1)

    @pl.when(k == 0)
    def _():
        acc_ref[...] = jnp.zeros_like(acc_ref)

    acc_ref[...] += jnp.dot(adj_ref[...], fts_ref[...],
                            preferred_element_type=jnp.float32)

    @pl.when(k == pl.num_programs(1) - 1)
    def _():
        alpha = alpha_ref[0]
        out = acc_ref[...] + bias_ref[...]          # bias_ref is (1, Fout)
        out = jnp.where(out >= 0.0, out, alpha * out)
        out_ref[...] = out.astype(out_ref.dtype)


def gcn_forward(seq, adj, weight_t, bias, alpha, *, tm=512, tk=512):
    """seq: (N, in_ft), adj: (N, N), weight_t: (in_ft, out_ft),
    bias: (out_ft,), alpha: scalar -> (N, out_ft) float32."""
    N, in_ft = seq.shape
    out_ft = weight_t.shape[1]

    # Lane-dense padding of feature dims to multiples of 128.
    Fin = _round_up(in_ft, 128)
    Fout = _round_up(out_ft, 128)

    # Row (M) tile and contraction (K) tile over the node dimension, clamped
    # for small inputs.  512 is a multiple of 256 and 128 (MXU-native on
    # v5e/v6e/v7x) and keeps VMEM use far below every chip's scoped limit.
    tm = min(tm, _round_up(N, 8))
    tk = min(tk, _round_up(N, 128))
    Mp = _round_up(N, tm)     # padded rows of adj / output
    Kp = _round_up(N, tk)     # padded contraction dim (= padded rows of seq)

    # Zero-padded operands (zeros keep the matmul exact on the valid block).
    seq_pad = jnp.zeros((Kp, Fin), jnp.float32).at[:N, :in_ft].set(seq)
    w_pad = jnp.zeros((Fin, Fout), jnp.float32).at[:in_ft, :out_ft].set(weight_t)
    adj_pad = jnp.zeros((Mp, Kp), jnp.float32).at[:N, :N].set(adj)
    bias_pad = jnp.zeros((1, Fout), jnp.float32).at[0, :out_ft].set(bias)
    alpha_arr = jnp.asarray([alpha], dtype=jnp.float32)

    # Stage 1: compute seq_fts once; reused for every row tile of stage 2.
    seq_fts = _compute_seq_fts(seq_pad, w_pad, tk)

    grid = (Mp // tm, Kp // tk)
    flops = 2 * Mp * Kp * Fout
    bytes_accessed = 4 * (Mp * Kp + Kp * Fout + Mp * Fout)

    out_pad = pl.pallas_call(
        _adj_agg_kernel,
        out_shape=jax.ShapeDtypeStruct((Mp, Fout), jnp.float32),
        grid_spec=pltpu.PrefetchScalarGridSpec(
            num_scalar_prefetch=1,                     # alpha -> SMEM
            grid=grid,
            in_specs=[
                pl.BlockSpec((tm, tk), lambda i, k, a: (i, k)),     # adj tile
                pl.BlockSpec((tk, Fout), lambda i, k, a: (k, 0)),   # seq_fts K-slice
                pl.BlockSpec((1, Fout), lambda i, k, a: (0, 0)),    # bias
            ],
            out_specs=pl.BlockSpec((tm, Fout), lambda i, k, a: (i, 0)),
            scratch_shapes=[pltpu.VMEM((tm, Fout), jnp.float32)],   # accumulator
        ),
        compiler_params=pltpu.CompilerParams(
            dimension_semantics=("parallel", "arbitrary")),
        cost_estimate=pl.CostEstimate(flops=flops, transcendentals=0,
                                      bytes_accessed=bytes_accessed),
    )(alpha_arr, adj_pad, seq_fts, bias_pad)

    return out_pad[:N, :out_ft]


# ------------------------------ init helpers ---------------------------------

def xavier_uniform(key, shape):
    # matches torch.nn.init.xavier_uniform_ for a Linear weight (out_ft, in_ft)
    fan_out, fan_in = shape
    limit = float(np.sqrt(6.0 / (fan_in + fan_out)))
    return jax.random.uniform(key, shape, jnp.float32, -limit, limit)


def _reference(seq, adj, weight_t, bias, alpha):
    ref = adj @ (seq @ weight_t) + bias
    return jnp.where(ref >= 0, ref, alpha * ref)


if __name__ == "__main__":
    key = jax.random.PRNGKey(0)
    k_seq, k_adj, k_w, k_seq2, k_adj2, k_w2 = jax.random.split(key, 6)

    # ---- small case matching the module's typical toy shapes ----
    N, in_ft, out_ft = 8, 16, 32
    seq = jax.random.normal(k_seq, (N, in_ft), jnp.float32)
    adj = jax.random.uniform(k_adj, (N, N), jnp.float32)
    weight = xavier_uniform(k_w, (out_ft, in_ft))   # nn.Linear weight
    weight_t = weight.T                             # (in_ft, out_ft)
    bias = jnp.zeros((out_ft,), jnp.float32)        # filled with 0.0
    alpha = 0.25                                    # nn.PReLU() default slope

    out = jax.block_until_ready(gcn_forward(seq, adj, weight_t, bias, alpha))
    ref = _reference(seq, adj, weight_t, bias, alpha)
    np.testing.assert_allclose(np.asarray(out), np.asarray(ref),
                               rtol=1e-5, atol=1e-5)

    # ---- non-aligned, multi-tile case to exercise the K-reduction grid ----
    N2, in2, out2 = 300, 48, 96
    seq2 = jax.random.normal(k_seq2, (N2, in2), jnp.float32)
    adj2 = jax.random.uniform(k_adj2, (N2, N2), jnp.float32)
    w2 = xavier_uniform(k_w2, (out2, in2)).T
    b2 = jnp.zeros((out2,), jnp.float32)

    out2_k = jax.block_until_ready(
        gcn_forward(seq2, adj2, w2, b2, alpha, tm=128, tk=128))
    ref2 = _reference(seq2, adj2, w2, b2, alpha)
    np.testing.assert_allclose(np.asarray(out2_k), np.asarray(ref2),
                               rtol=1e-4, atol=1e-4)

    print("KERNEL_OK")
</pallas_src>

<mosaic_0001>
module attributes {stable_mosaic.version = 11 : i64} {
  func.func @_fts_kernel(%arg0: i32, %arg1: memref<128x128xf32, #tpu.memory_space<vmem>>, %arg2: memref<128x128xf32, #tpu.memory_space<vmem>>, %arg3: memref<128x128xf32, #tpu.memory_space<vmem>>) attributes {dimension_semantics = [#tpu.dimension_semantics<parallel>], iteration_bounds = array<i64: 1>, scalar_prefetch = 0 : i64, scratch_operands = 0 : i64, tpu.core_type = #tpu.core_type<tc>, window_params = [{transform_indices = @transform_0, window_bounds = array<i64: 128, 128>}, {pipeline_mode = #tpu.pipeline_mode<synchronous>, transform_indices = @transform_1, window_bounds = array<i64: 128, 128>}, {transform_indices = @transform_2, window_bounds = array<i64: 128, 128>}]} {
    %c0 = arith.constant 0 : index
    %c0_0 = arith.constant 0 : index
    %0 = vector.load %arg1[%c0, %c0_0] : memref<128x128xf32, #tpu.memory_space<vmem>>, vector<128x128xf32>
    %c0_1 = arith.constant 0 : index
    %c0_2 = arith.constant 0 : index
    %1 = vector.load %arg2[%c0_1, %c0_2] : memref<128x128xf32, #tpu.memory_space<vmem>>, vector<128x128xf32>
    %cst = arith.constant dense<0.000000e+00> : vector<128x128xf32>
    %2 = tpu.matmul %0, %1, %cst {dimension_numbers = #tpu.dot_dimension_numbers<[1], [0], [0], [1], [0, 0, 1, 1], [], []>} : vector<128x128xf32>, vector<128x128xf32>, vector<128x128xf32> -> vector<128x128xf32>
    %c0_3 = arith.constant 0 : index
    %c0_4 = arith.constant 0 : index
    %3 = vector.load %arg3[%c0_3, %c0_4] : memref<128x128xf32, #tpu.memory_space<vmem>>, vector<128x128xf32>
    tpu.vector_store %arg3[%c0_3, %c0_4], %2 {strides = array<i32>} : memref<128x128xf32, #tpu.memory_space<vmem>>, vector<128x128xf32>,
    return
  }
  func.func @transform_0(%arg0: i32) -> (i32, i32) {
    %c0_i32 = arith.constant 0 : i32
    %c0_i32_0 = arith.constant 0 : i32
    return %arg0, %c0_i32 : i32, i32
  }
  func.func @transform_1(%arg0: i32) -> (i32, i32) {
    %c0_i32 = arith.constant 0 : i32
    %c0_i32_0 = arith.constant 0 : i32
    %c0_i32_1 = arith.constant 0 : i32
    return %c0_i32, %c0_i32_0 : i32, i32
  }
  func.func @transform_2(%arg0: i32) -> (i32, i32) {
    %c0_i32 = arith.constant 0 : i32
    %c0_i32_0 = arith.constant 0 : i32
    return %arg0, %c0_i32 : i32, i32
  }
}

</mosaic_0001>

<bundles_post_ra>
// kernel: tpu_custom_call.1
= control target key start
LH: loop header
LB: loop body
LE: loop exit
PB: predicated region body
PF: predicated region fallthrough
CT: control target
= control target key end

     0   :  { %7 = vsyncpa [#allocation3], 0  ;;  %s480_s0 = inlined_call_operand.hbm [shape: f32[128,128], index: 0, kind: input, shape index: {}]   ;;  %s481_s1 = inlined_call_operand.hbm [shape: f32[128,128], index: 1, kind: input, shape index: {}]   ;;  %s482_s2 = inlined_call_operand.hbm [shape: f32[128,128], index: 2, kind: output, shape index: {}]  }
   0x1   :  { %8 = vsyncpa [#allocation6], 0 }
   0x2   :  { %9 = vsyncpa [#allocation4], 0  ;;  %s442_s9 = smov [#allocation2]  }
   0x3   :  { %s15_s10 = sshll.u32 %s442_s9, 4  ;;  %s16_s10 = int_to_ptr.vmem [resolvable:$true] %s15_s10 }
   0x4   :  { %s384_s11 = scalar_lea.vmem %s16_s10, 2048  ;;  %p389_p1 = scmp.lt.s32.totalorder %s16_s10, %s16_s10 }
   0x5   :  { %p385_p0 = scmp.ne.s32.totalorder %s16_s10, %s384_s11  ;;  %p390_p2 = scmp.lt.s32.totalorder %s384_s11, %s384_s11 }
   0x7   :  { %p391_p3 = por %p390_p2, %p389_p1 }
   0x9   :  { %p392_p4 = pnand %p391_p3, %p385_p0 }
   0xb   :  { %395 = shalt.err (!%p392_p4)
}
   0xc   :  { %s443_s12 = smov 128   ;;  %s444_s13 = smov 8  }
   0xd   :  { %21 = dma.hbm_to_vmem [thread:$0]  %s480_s0, 2048, %s16_s10, [#allocation3], %s443_s12, %s443_s12, %s444_s13  }
   0xe   :  { %s445_s16 = smov [#allocation5]  }
   0xf   :  { %s27_s17 = sshll.u32 %s445_s16, 4  ;;  %s28_s17 = int_to_ptr.vmem [resolvable:$true] %s27_s17 }
  0x10   :  { %s404_s18 = scalar_lea.vmem %s28_s17, 2048  ;;  %p409_p6 = scmp.lt.s32.totalorder %s28_s17, %s28_s17 }
  0x11   :  { %p405_p5 = scmp.ne.s32.totalorder %s28_s17, %s404_s18  ;;  %p410_p7 = scmp.lt.s32.totalorder %s404_s18, %s404_s18 }
  0x13   :  { %p411_p8 = por %p410_p7, %p409_p6 }
  0x15   :  { %p412_p9 = pnand %p411_p8, %p405_p5 }
  0x17   :  { %415 = shalt.err (!%p412_p9)
}
  0x18   :  { %33 = dma.hbm_to_vmem [thread:$0]  %s481_s1, 2048, %s28_s17, [#allocation6], %s443_s12, %s443_s12, %s444_s13  }
  0x19   :  { %436 = dma.done.wait [#allocation3], 2048  }
  0x1a   :  { %437 = vsyncadd [#allocation3], 4294965248 }
  0x1b   :  { %438 = dma.done.wait [#allocation6], 2048  }
  0x1c   :  { %439 = vsyncadd [#allocation6], 4294965248  ;;  %v71_v0 = vld [vmem:[#allocation5 + $0x78] sm:$0xff]  ;;  %v70_v1 = vld [vmem:[#allocation5 + $0x70] sm:$0xff]  ;;  %s446_s0 = smov [#allocation7]  }
  0x1d   :  { %283 = vmatprep.subr.mxu0 %v71_v0  ;;  %339 = vmatprep.subr.mxu1 %v71_v0  ;;  %v69_v2 = vld [vmem:[#allocation5 + $0x68] sm:$0xff]  ;;  %v68_v3 = vld [vmem:[#allocation5 + $0x60] sm:$0xff]  ;;  %v67_v4 = vld [vmem:[#allocation5 + $0x58] sm:$0xff]  ;;  %s238_s1 = sshll.u32 %s446_s0, 4  ;;  %s239_s1 = int_to_ptr.vmem [resolvable:$true] %s238_s1 }
  0x1e   :  { %284 = vmatpush3.msra.mxu0 %v71_v0  ;;  %355 = vmatpush3.msra.mxu1 %v71_v0  ;;  %v66_v5 = vld [vmem:[#allocation5 + $0x50] sm:$0xff]  ;;  %v65_v6 = vld [vmem:[#allocation5 + $0x48] sm:$0xff]  ;;  %v64_v7 = vld [vmem:[#allocation5 + $0x40] sm:$0xff]  ;;  %s416_s21 = scalar_lea.vmem %s239_s1, 2048  ;;  %p421_p11 = scmp.lt.s32.totalorder %s239_s1, %s239_s1 }
  0x1f   :  { %285 = vmatprep.subr.mxu0 %v70_v1  ;;  %340 = vmatprep.subr.mxu1 %v70_v1  ;;  %v63_v8 = vld [vmem:[#allocation5 + $0x38] sm:$0xff]  ;;  %v62_v9 = vld [vmem:[#allocation5 + $0x30] sm:$0xff]  ;;  %v61_v10 = vld [vmem:[#allocation5 + $0x28] sm:$0xff]  ;;  %p417_p10 = scmp.ne.s32.totalorder %s239_s1, %s416_s21  ;;  %p422_p12 = scmp.lt.s32.totalorder %s416_s21, %s416_s21 }
  0x20   :  { %286 = vmatpush3.msra.mxu0 %v70_v1  ;;  %356 = vmatpush3.msra.mxu1 %v70_v1  ;;  %v60_v11 = vld [vmem:[#allocation5 + $0x20] sm:$0xff]  ;;  %v59_v12 = vld [vmem:[#allocation5 + $0x18] sm:$0xff]  ;;  %v58_v13 = vld [vmem:[#allocation5 + $0x10] sm:$0xff] }
  0x21   :  { %287 = vmatprep.subr.mxu0 %v69_v2  ;;  %341 = vmatprep.subr.mxu1 %v69_v2  ;;  %v57_v14 = vld [vmem:[#allocation5 + $0x8] sm:$0xff]  ;;  %v56_v15 = vld [vmem:[#allocation5] sm:$0xff]  ;;  %v42_v20 = vld [vmem:[#allocation2 + $0x10] sm:$0xff]  ;;  %p423_p13 = por %p422_p12, %p421_p11 }
  0x22   :  { %288 = vmatpush3.msra.mxu0 %v69_v2  ;;  %357 = vmatpush3.msra.mxu1 %v69_v2  ;;  %v40_v16 = vld [vmem:[#allocation2] sm:$0xff]  ;;  %v41_v18 = vld [vmem:[#allocation2 + $0x8] sm:$0xff]  ;;  %v50_v21 = vld [vmem:[#allocation2 + $0x50] sm:$0xff] }
  0x23   :  { %289 = vmatprep.subr.mxu0 %v68_v3  ;;  %342 = vmatprep.subr.mxu1 %v68_v3  ;;  %v48_v17 = vld [vmem:[#allocation2 + $0x40] sm:$0xff]  ;;  %v49_v19 = vld [vmem:[#allocation2 + $0x48] sm:$0xff]  ;;  %v43_v22 = vld [vmem:[#allocation2 + $0x18] sm:$0xff]  ;;  %p424_p0 = pnand %p423_p13, %p417_p10 }
  0x24   :  { %290 = vmatpush3.msra.mxu0 %v68_v3  ;;  %358 = vmatpush3.msra.mxu1 %v68_v3  ;;  %v51_v23 = vld [vmem:[#allocation2 + $0x58] sm:$0xff]  ;;  %v44_v24 = vld [vmem:[#allocation2 + $0x20] sm:$0xff]  ;;  %v45_v26 = vld [vmem:[#allocation2 + $0x28] sm:$0xff] }
  0x25   :  { %291 = vmatprep.subr.mxu0 %v67_v4  ;;  %343 = vmatprep.subr.mxu1 %v67_v4  ;;  %v52_v25 = vld [vmem:[#allocation2 + $0x60] sm:$0xff]  ;;  %v53_v27 = vld [vmem:[#allocation2 + $0x68] sm:$0xff]  ;;  %v46_v28 = vld [vmem:[#allocation2 + $0x30] sm:$0xff] }
  0x26   :  { %292 = vmatpush3.msra.mxu0 %v67_v4  ;;  %359 = vmatpush3.msra.mxu1 %v67_v4  ;;  %v54_v29 = vld [vmem:[#allocation2 + $0x70] sm:$0xff]  ;;  %v47_v30 = vld [vmem:[#allocation2 + $0x38] sm:$0xff] }
  0x27   :  { %293 = vmatprep.subr.mxu0 %v66_v5  ;;  %344 = vmatprep.subr.mxu1 %v66_v5  ;;  %v55_v31 = vld [vmem:[#allocation2 + $0x78] sm:$0xff] }
  0x28   :  { %294 = vmatpush3.msra.mxu0 %v66_v5  ;;  %360 = vmatpush3.msra.mxu1 %v66_v5 }
  0x29   :  { %295 = vmatprep.subr.mxu0 %v65_v6  ;;  %345 = vmatprep.subr.mxu1 %v65_v6 }
  0x2a   :  { %296 = vmatpush3.msra.mxu0 %v65_v6  ;;  %361 = vmatpush3.msra.mxu1 %v65_v6 }
  0x2b   :  { %297 = vmatprep.subr.mxu0 %v64_v7  ;;  %346 = vmatprep.subr.mxu1 %v64_v7 }
  0x2c   :  { %298 = vmatpush3.msra.mxu0 %v64_v7  ;;  %362 = vmatpush3.msra.mxu1 %v64_v7 }
  0x2d   :  { %299 = vmatprep.subr.mxu0 %v63_v8  ;;  %347 = vmatprep.subr.mxu1 %v63_v8 }
  0x2e   :  { %300 = vmatpush3.msra.mxu0 %v63_v8  ;;  %363 = vmatpush3.msra.mxu1 %v63_v8 }
  0x2f   :  { %301 = vmatprep.subr.mxu0 %v62_v9  ;;  %348 = vmatprep.subr.mxu1 %v62_v9 }
  0x30   :  { %302 = vmatpush3.msra.mxu0 %v62_v9  ;;  %364 = vmatpush3.msra.mxu1 %v62_v9 }
  0x31   :  { %303 = vmatprep.subr.mxu0 %v61_v10  ;;  %349 = vmatprep.subr.mxu1 %v61_v10 }
  0x32   :  { %304 = vmatpush3.msra.mxu0 %v61_v10  ;;  %365 = vmatpush3.msra.mxu1 %v61_v10 }
  0x33   :  { %305 = vmatprep.subr.mxu0 %v60_v11  ;;  %350 = vmatprep.subr.mxu1 %v60_v11 }
  0x34   :  { %306 = vmatpush3.msra.mxu0 %v60_v11  ;;  %366 = vmatpush3.msra.mxu1 %v60_v11 }
  0x35   :  { %307 = vmatprep.subr.mxu0 %v59_v12  ;;  %351 = vmatprep.subr.mxu1 %v59_v12 }
  0x36   :  { %308 = vmatpush3.msra.mxu0 %v59_v12  ;;  %367 = vmatpush3.msra.mxu1 %v59_v12 }
  0x37   :  { %309 = vmatprep.subr.mxu0 %v58_v13  ;;  %352 = vmatprep.subr.mxu1 %v58_v13 }
  0x38   :  { %310 = vmatpush3.msra.mxu0 %v58_v13  ;;  %368 = vmatpush3.msra.mxu1 %v58_v13 }
  0x39   :  { %311 = vmatprep.subr.mxu0 %v57_v14  ;;  %353 = vmatprep.subr.mxu1 %v57_v14 }
  0x3a   :  { %312 = vmatpush3.msra.mxu0 %v57_v14  ;;  %369 = vmatpush3.msra.mxu1 %v57_v14 }
  0x3b   :  { %313 = vmatprep.subr.mxu0 %v56_v15  ;;  %354 = vmatprep.subr.mxu1 %v56_v15 }
  0x3c   :  { %314 = vmatpush3.msra.mxu0 %v56_v15  ;;  %370 = vmatpush3.msra.mxu1 %v56_v15 }
  0x3d   :  { %315 = vmatprep.mubr.f32.mxu0 %v40_v16  ;;  %327 = vmatprep.mubr.f32.mxu1 %v48_v17 }
  0x3e   :  { %316 = vmatmul.mubr.f32.vlgmr.msra.gmra.mxu0 %v41_v18  ;;  %328 = vmatmul.mubr.f32.vlgmr.msra.gmra.mxu1 %v49_v19 }
  0x3f   :  { %318 = vmatprep.mubr.f32.mxu0 %v42_v20  ;;  %330 = vmatprep.mubr.f32.mxu1 %v50_v21 }
  0x42   :  { %319 = vmatmul.mubr.f32.gmra.mxu0 %v43_v22  ;;  %331 = vmatmul.mubr.f32.gmra.mxu1 %v51_v23 }
  0x43   :  { %321 = vmatprep.mubr.f32.mxu0 %v44_v24  ;;  %333 = vmatprep.mubr.f32.mxu1 %v52_v25 }
  0x46   :  { %322 = vmatmul.mubr.f32.gmra.mxu0 %v45_v26  ;;  %334 = vmatmul.mubr.f32.gmra.mxu1 %v53_v27 }
  0x47   :  { %324 = vmatprep.mubr.f32.mxu0 %v46_v28  ;;  %336 = vmatprep.mubr.f32.mxu1 %v54_v29 }
  0x4a   :  { %325 = vmatmul.mubr.f32.gmra.mxu0 %v47_v30  ;;  %337 = vmatmul.mubr.f32.gmra.mxu1 %v55_v31 }
  0xfe   :  { %v317_v32 = vpop.f32.mrf.mxu0  ;;  %v329_v33 = vpop.f32.mrf.mxu1 }
  0xff   :  { %218 = vst [vmem:[#allocation7 + $0x8] sm:$0xff] %v317_v32  ;;  %226 = vst [vmem:[#allocation7 + $0x48] sm:$0xff] %v329_v33 }
 0x100   :  { %v138_v34 = vpop.f32.mrf.mxu0  ;;  %v178_v35 = vpop.f32.mrf.mxu1 }
 0x101   :  { %217 = vst [vmem:[#allocation7] sm:$0xff] %v138_v34  ;;  %225 = vst [vmem:[#allocation7 + $0x40] sm:$0xff] %v178_v35 }
 0x102   :  { %v320_v36 = vpop.f32.mrf.mxu0  ;;  %v332_v37 = vpop.f32.mrf.mxu1 }
 0x103   :  { %220 = vst [vmem:[#allocation7 + $0x18] sm:$0xff] %v320_v36  ;;  %228 = vst [vmem:[#allocation7 + $0x58] sm:$0xff] %v332_v37 }
 0x104   :  { %v148_v38 = vpop.f32.mrf.mxu0  ;;  %v188_v39 = vpop.f32.mrf.mxu1 }
 0x105   :  { %219 = vst [vmem:[#allocation7 + $0x10] sm:$0xff] %v148_v38  ;;  %227 = vst [vmem:[#allocation7 + $0x50] sm:$0xff] %v188_v39 }
 0x106   :  { %v323_v40 = vpop.f32.mrf.mxu0  ;;  %v335_v41 = vpop.f32.mrf.mxu1 }
 0x107   :  { %222 = vst [vmem:[#allocation7 + $0x28] sm:$0xff] %v323_v40  ;;  %230 = vst [vmem:[#allocation7 + $0x68] sm:$0xff] %v335_v41 }
 0x108   :  { %v158_v42 = vpop.f32.mrf.mxu0  ;;  %v198_v43 = vpop.f32.mrf.mxu1 }
 0x109   :  { %221 = vst [vmem:[#allocation7 + $0x20] sm:$0xff] %v158_v42  ;;  %229 = vst [vmem:[#allocation7 + $0x60] sm:$0xff] %v198_v43 }
 0x10a   :  { %v326_v44 = vpop.f32.mrf.mxu0  ;;  %v338_v45 = vpop.f32.mrf.mxu1 }
 0x10b   :  { %224 = vst [vmem:[#allocation7 + $0x38] sm:$0xff] %v326_v44  ;;  %232 = vst [vmem:[#allocation7 + $0x78] sm:$0xff] %v338_v45 }
 0x10c   :  { %v168_v46 = vpop.f32.mrf.mxu0  ;;  %v208_v47 = vpop.f32.mrf.mxu1 }
 0x10d   :  { %223 = vst [vmem:[#allocation7 + $0x30] sm:$0xff] %v168_v46  ;;  %231 = vst [vmem:[#allocation7 + $0x70] sm:$0xff] %v208_v47 }
 0x10e   :  { %427 = shalt.err (!%p424_p0)
}
 0x10f   :  { %244 = dma.vmem_to_hbm [thread:$0]  %s239_s1, 2048, %s482_s2, [#allocation4], %s443_s12, %s443_s12, %s444_s13  }
 0x110   :  { %440 = dma.done.wait [#allocation4], 2048  }
 0x111   :  { %441 = vsyncadd [#allocation4], 4294965248 }
 0x112   :  { %248 = vsyncpa [#allocation3], 1 }
 0x113   :  { %249 = vsyncpa [#allocation6], 1 }
 0x114   :  { %250 = vsyncpa [#allocation4], 1 }

</bundles_post_ra>
